<compile_context>
chip_gen: v5e
topology: v5e:2x2
jax: 0.10.0
libtpu: 0.0.40
codegen_flags: <defaults>
</compile_context>

<pallas_src>
import functools

import jax
import jax.numpy as jnp
from jax import lax
from jax.experimental import pallas as pl
from jax.experimental.pallas import tpu as pltpu


# ---------------------------------------------------------------------------
# Kernel 1: power iteration -> inv_sigma, u_new, v_new.
# Whole (small) weight matrix lives in a single VMEM block; all math in f32.
# ---------------------------------------------------------------------------
def _spectral_norm_kernel(w_ref, u_ref, inv_sigma_ref, u_out_ref, v_out_ref,
                          *, power_iterations: int, eps: float):
    w = w_ref[...]                 # (H, Wd) f32
    w_t = w.T                      # transposed ONCE (hoisted out of the loop)
    u = u_ref[...]                 # (1, H)  f32, lane-dense row vector
    wv = None
    for _ in range(power_iterations):
        # v = l2normalize(W^T u):  (1,H) @ (H,Wd) -> (1,Wd)
        v = jnp.dot(u, w, preferred_element_type=jnp.float32)
        # rsqrt goes to the EUP; eps^2 inside keeps it ~= v/(||v||+eps) (diff ~1e-12)
        v = v * lax.rsqrt(jnp.sum(v * v) + eps * eps)
        # u = l2normalize(W v):    (1,Wd) @ (Wd,H) -> (1,H)
        wv = jnp.dot(v, w_t, preferred_element_type=jnp.float32)
        u = wv * lax.rsqrt(jnp.sum(wv * wv) + eps * eps)

    # sigma = u . (W v) with the updated u (exactly like the PyTorch code).
    sigma = jnp.sum(u * wv)
    inv_sigma_ref[...] = (1.0 / sigma).reshape(1, 1)   # exact reciprocal
    u_out_ref[...] = u                                  # (1, H)  lane-dense
    v_out_ref[...] = v                                  # (1, Wd) lane-dense


def spectral_normalize_stats(w_bar, u, *, power_iterations=1, eps=1e-12):
    """w_bar: (O,I,KH,KW), u: (O,). Returns (inv_sigma (1,1), u_new (O,), v_new (K,))."""
    assert power_iterations >= 1, "power_iterations must be >= 1"
    O = w_bar.shape[0]
    w_mat = w_bar.reshape(O, -1).astype(jnp.float32)      # (H, Wd)
    H, Wd = w_mat.shape
    u_row = u.reshape(1, H).astype(jnp.float32)

    kernel = functools.partial(_spectral_norm_kernel,
                               power_iterations=power_iterations, eps=eps)
    inv_sigma, u_new, v_new = pl.pallas_call(
        kernel,
        out_shape=(jax.ShapeDtypeStruct((1, 1), jnp.float32),
                   jax.ShapeDtypeStruct((1, H), jnp.float32),
                   jax.ShapeDtypeStruct((1, Wd), jnp.float32)),
        in_specs=[pl.BlockSpec(memory_space=pltpu.MemorySpace.VMEM),
                  pl.BlockSpec(memory_space=pltpu.MemorySpace.VMEM)],
        out_specs=(pl.BlockSpec(memory_space=pltpu.MemorySpace.VMEM),
                   pl.BlockSpec(memory_space=pltpu.MemorySpace.VMEM),
                   pl.BlockSpec(memory_space=pltpu.MemorySpace.VMEM)),
    )(w_mat, u_row)

    return inv_sigma, u_new.reshape(H), v_new.reshape(Wd)


# ---------------------------------------------------------------------------
# Kernel 2: fused im2col + conv as 9 shifted-window matmuls on the flattened
# H*W lane axis, f32 accumulate, sigma normalization + bias fused in the
# epilogue, bf16 lane-dense store.
# ---------------------------------------------------------------------------
def _conv3x3_fused_kernel(inv_sigma_ref, w_ref, bias_ref, x_ref, o_ref,
                          *, H, W, KH, KW, pad_h, pad_w):
    # inv_sigma_ref: (1,1) f32 SMEM        w_ref: (KH*KW, tile_o, C) bf16 (raw w_bar taps)
    # bias_ref:      (tile_o, 1) f32       x_ref: (C, H*W)  input dtype
    # o_ref:         (tile_o, H*W) out dtype
    HW = H * W
    tile_o = o_ref.shape[0]
    x = x_ref[...]                                           # (C, HW)

    pos = lax.broadcasted_iota(jnp.int32, (1, HW), 1)
    row = pos // W
    col = pos - row * W

    acc = jnp.zeros((tile_o, HW), jnp.float32)
    for ki in range(KH):
        for kj in range(KW):
            di = ki - pad_h
            dj = kj - pad_w
            delta = di * W + dj                              # flattened source offset
            shift = (-delta) % HW                            # roll so shifted[p] = x[p+delta]
            shifted = pltpu.roll(x, shift, axis=1) if shift else x
            # (tile_o, C) @ (C, HW) on the MXU, bf16 operands, f32 accumulate.
            part = jnp.dot(w_ref[ki * KW + kj], shifted.astype(jnp.bfloat16),
                           preferred_element_type=jnp.float32)   # (tile_o, HW)
            # Zero contributions whose source pixel falls outside the image
            # (this *is* the conv zero-padding; mask depends only on position).
            conds = []
            if di < 0:
                conds.append(row >= -di)
            if di > 0:
                conds.append(row < H - di)
            if dj < 0:
                conds.append(col >= -dj)
            if dj > 0:
                conds.append(col < W - dj)
            if conds:
                mask = functools.reduce(lambda a, b: a & b, conds)   # (1, HW)
                part = jnp.where(mask, part, 0.0)
            acc = acc + part

    inv_sigma = inv_sigma_ref[0, 0]                          # scalar f32 (SMEM)
    o_ref[...] = (acc * inv_sigma + bias_ref[...]).astype(o_ref.dtype)


def _conv_block_vmem_bytes(C, HW, tile_o, taps, x_itemsize, out_itemsize):
    """Rough per-step VMEM footprint: double-buffered pipeline blocks + live values."""
    x_blocks = 2 * C * HW * x_itemsize
    w_blocks = 2 * taps * tile_o * C * 2
    b_blocks = 2 * tile_o * 4
    o_blocks = 2 * tile_o * HW * out_itemsize
    live = C * HW * (x_itemsize + 2) + 2 * tile_o * HW * 4 + 4 * HW * 4
    return x_blocks + w_blocks + b_blocks + o_blocks + live


def _pick_tile_o(O, C, HW, n_batch, taps, x_itemsize, out_itemsize,
                 budget_bytes=24 * 1024 * 1024):
    """Largest output-channel tile fitting a ~24 MiB block budget (v7x-safe)."""
    cands = [O] + [t for t in range(8 * (O // 8), 0, -8) if t < O and O % t == 0]
    tile_o = cands[-1]
    for t in cands:
        if _conv_block_vmem_bytes(C, HW, t, taps, x_itemsize, out_itemsize) <= budget_bytes:
            tile_o = t
            break
    # v7x has 2 TensorCores: make sure the ("parallel","parallel") grid has >=2 steps.
    if n_batch * (O // tile_o) < 2:
        smaller = [t for t in cands if t < tile_o]
        if smaller:
            tile_o = smaller[0]
    return tile_o


def conv2d_spectral_pallas(x_nchw, w_bar, bias, inv_sigma, *,
                           padding=(1, 1), out_dtype=jnp.bfloat16):
    """'same' 3x3, stride-1 conv of x (NCHW) with (w_bar / sigma), bias added.

    im2col is fused into the kernel (9 shifted-window matmuls); the division by
    sigma is fused into the epilogue via inv_sigma (SMEM scalar)."""
    N, C, H, W = x_nchw.shape
    O, Ci, KH, KW = w_bar.shape
    assert Ci == C, "channel mismatch"
    pad_h, pad_w = padding
    # Explicit config asserts (stride is fixed to 1 by construction here).
    assert KH == 2 * pad_h + 1 and KW == 2 * pad_w + 1, (
        "only 'same' stride-1 convs with symmetric padding are supported "
        "(TODO(synk): general stride/padding)")

    HW = H * W
    taps = KH * KW
    x_flat = x_nchw.reshape(N, C, HW)                              # free reshape
    # Per-tap weight matrices, tap-major: (KH*KW, O, C), bf16 for the MXU.
    w_taps = jnp.transpose(w_bar, (2, 3, 0, 1)).reshape(taps, O, C).astype(jnp.bfloat16)
    bias_col = bias.reshape(O, 1).astype(jnp.float32)

    x_itemsize = jnp.dtype(x_flat.dtype).itemsize
    out_itemsize = jnp.dtype(out_dtype).itemsize
    tile_o = _pick_tile_o(O, C, HW, N, taps, x_itemsize, out_itemsize)
    footprint = _conv_block_vmem_bytes(C, HW, tile_o, taps, x_itemsize, out_itemsize)
    assert footprint <= 48 * 1024 * 1024, (
        "activation too large for whole-image blocks; "
        "TODO(synk): spatial tiling with row halos")
    vmem_limit = int(min(max(2 * footprint, 16 * 1024 * 1024), 48 * 1024 * 1024))

    kernel = functools.partial(_conv3x3_fused_kernel, H=H, W=W, KH=KH, KW=KW,
                               pad_h=pad_h, pad_w=pad_w)
    out = pl.pallas_call(
        kernel,
        out_shape=jax.ShapeDtypeStruct((N, O, HW), out_dtype),
        grid_spec=pltpu.PrefetchScalarGridSpec(
            num_scalar_prefetch=0,
            grid=(N, O // tile_o),      # oi inner: x block index unchanged -> no refetch
            in_specs=[
                pl.BlockSpec(memory_space=pltpu.MemorySpace.SMEM),            # inv_sigma
                pl.BlockSpec((taps, tile_o, C), lambda n, oi: (0, oi, 0)),    # per-tap W
                pl.BlockSpec((tile_o, 1), lambda n, oi: (oi, 0)),             # bias
                pl.BlockSpec((pl.Squeezed(), C, HW), lambda n, oi: (n, 0, 0)),  # x
            ],
            out_specs=pl.BlockSpec((pl.Squeezed(), tile_o, HW),
                                   lambda n, oi: (n, oi, 0)),
        ),
        compiler_params=pltpu.CompilerParams(
            dimension_semantics=("parallel", "parallel"),
            vmem_limit_bytes=vmem_limit,
        ),
    )(inv_sigma, w_taps, bias_col, x_flat)

    # (N, O, H*W) -> NCHW is a free reshape (no transpose).
    return out.reshape(N, O, H, W)


# ---------------------------------------------------------------------------
# SpectralNorm(Conv2d).forward
# ---------------------------------------------------------------------------
def spectral_norm_conv2d_forward(x, w_bar, bias, u, *, power_iterations=1,
                                 out_dtype=jnp.bfloat16):
    inv_sigma, u_new, v_new = spectral_normalize_stats(
        w_bar, u, power_iterations=power_iterations)
    y = conv2d_spectral_pallas(x, w_bar, bias, inv_sigma, padding=(1, 1),
                               out_dtype=out_dtype)
    return y, u_new, v_new


# ---------------------------------------------------------------------------
# Pure-JAX f32 reference for verification.
# ---------------------------------------------------------------------------
def _l2n(v, eps=1e-12):
    return v / (jnp.linalg.norm(v) + eps)


def _reference(x, w_bar, bias, u, power_iterations=1):
    O = w_bar.shape[0]
    w_mat = w_bar.reshape(O, -1)
    uu = u
    for _ in range(power_iterations):
        vv = _l2n(w_mat.T @ uu)
        uu = _l2n(w_mat @ vv)
    sigma = uu @ (w_mat @ vv)
    w_n = w_bar / sigma
    y = lax.conv_general_dilated(
        x, w_n, window_strides=(1, 1), padding=[(1, 1), (1, 1)],
        dimension_numbers=("NCHW", "OIHW", "NCHW"))
    return y + bias.reshape(1, -1, 1, 1), uu, vv


if __name__ == "__main__":
    key = jax.random.PRNGKey(0)
    k1, k2, k3, k4, k5 = jax.random.split(key, 5)

    N, Cin, Cout, Hs, Ws, KH, KW = 2, 4, 8, 16, 16, 3, 3

    x = jax.random.normal(k1, (N, Cin, Hs, Ws), dtype=jnp.float32)
    w_bar = 0.1 * jax.random.normal(k2, (Cout, Cin, KH, KW), dtype=jnp.float32)
    bias = 0.1 * jax.random.normal(k3, (Cout,), dtype=jnp.float32)
    u = _l2n(jax.random.normal(k4, (Cout,), dtype=jnp.float32))
    # The module's `v` buffer is overwritten before first use in the power
    # iteration, so it does not affect the forward pass; kept for parity.
    v = _l2n(jax.random.normal(k5, (Cin * KH * KW,), dtype=jnp.float32))

    y, u_new, v_new = spectral_norm_conv2d_forward(x, w_bar, bias, u,
                                                   power_iterations=1)
    y = jax.block_until_ready(y)

    y_ref, u_ref, v_ref = _reference(x, w_bar, bias, u, power_iterations=1)
    assert y.shape == (N, Cout, Hs, Ws)
    # Power iteration runs entirely in f32 -> tight tolerance.
    assert jnp.allclose(u_new, u_ref, rtol=1e-4, atol=1e-4), "u mismatch"
    assert jnp.allclose(v_new, v_ref, rtol=1e-4, atol=1e-4), "v mismatch"
    # Conv uses bf16 MXU operands + bf16 output store (f32 accumulate/epilogue)
    # -> bf16-level tolerance.
    assert jnp.allclose(y.astype(jnp.float32), y_ref, rtol=3e-2, atol=3e-2), \
        "conv mismatch vs reference"

    print("KERNEL_OK")
</pallas_src>

<mosaic_0001>
module attributes {stable_mosaic.version = 11 : i64} {
  func.func @_spectral_norm_kernel(%arg0: memref<8x36xf32, #tpu.memory_space<vmem>>, %arg1: memref<1x8xf32, #tpu.memory_space<vmem>>, %arg2: memref<1x1xf32, #tpu.memory_space<vmem>>, %arg3: memref<1x8xf32, #tpu.memory_space<vmem>>, %arg4: memref<1x36xf32, #tpu.memory_space<vmem>>) attributes {dimension_semantics = [], scalar_prefetch = 0 : i64, scratch_operands = 0 : i64, tpu.core_type = #tpu.core_type<tc>} {
    %c0 = arith.constant 0 : index
    %c0_0 = arith.constant 0 : index
    %0 = vector.load %arg0[%c0, %c0_0] : memref<8x36xf32, #tpu.memory_space<vmem>>, vector<8x36xf32>
    %1 = tpu.transpose %0, [1, 0] : vector<8x36xf32> -> vector<36x8xf32>
    %c0_1 = arith.constant 0 : index
    %c0_2 = arith.constant 0 : index
    %2 = vector.load %arg1[%c0_1, %c0_2] : memref<1x8xf32, #tpu.memory_space<vmem>>, vector<1x8xf32>
    %cst = arith.constant dense<0.000000e+00> : vector<1x36xf32>
    %3 = tpu.matmul %2, %0, %cst {dimension_numbers = #tpu.dot_dimension_numbers<[1], [0], [0], [1], [0, 0, 1, 1], [], []>} : vector<1x8xf32>, vector<8x36xf32>, vector<1x36xf32> -> vector<1x36xf32>
    %4 = arith.mulf %3, %3 : vector<1x36xf32>
    %5 = vector.shape_cast %4 : vector<1x36xf32> to vector<1x1x36xf32>
    %cst_3 = arith.constant dense<0.000000e+00> : vector<1xf32>
    %6 = vector.multi_reduction <add>, %5, %cst_3 [1, 2] : vector<1x1x36xf32> to vector<1xf32>
    %7 = vector.shape_cast %6 : vector<1xf32> to vector<1x1x1xf32>
    %8 = vector.extract %7[0, 0, 0] : f32 from vector<1x1x1xf32>
    %cst_4 = arith.constant 1.000000e-24 : f32
    %9 = arith.addf %8, %cst_4 : f32
    %10 = math.rsqrt %9 : f32
    %11 = vector.broadcast %10 : f32 to vector<1x36xf32>
    %12 = arith.mulf %3, %11 : vector<1x36xf32>
    %cst_5 = arith.constant dense<0.000000e+00> : vector<1x8xf32>
    %13 = tpu.matmul %12, %1, %cst_5 {dimension_numbers = #tpu.dot_dimension_numbers<[1], [0], [0], [1], [0, 0, 1, 1], [], []>} : vector<1x36xf32>, vector<36x8xf32>, vector<1x8xf32> -> vector<1x8xf32>
    %14 = arith.mulf %13, %13 : vector<1x8xf32>
    %15 = vector.shape_cast %14 : vector<1x8xf32> to vector<1x1x8xf32>
    %cst_6 = arith.constant dense<0.000000e+00> : vector<1xf32>
    %16 = vector.multi_reduction <add>, %15, %cst_6 [1, 2] : vector<1x1x8xf32> to vector<1xf32>
    %17 = vector.shape_cast %16 : vector<1xf32> to vector<1x1x1xf32>
    %18 = vector.extract %17[0, 0, 0] : f32 from vector<1x1x1xf32>
    %cst_7 = arith.constant 1.000000e-24 : f32
    %19 = arith.addf %18, %cst_7 : f32
    %20 = math.rsqrt %19 : f32
    %21 = vector.broadcast %20 : f32 to vector<1x8xf32>
    %22 = arith.mulf %13, %21 : vector<1x8xf32>
    %23 = arith.mulf %22, %13 : vector<1x8xf32>
    %24 = vector.shape_cast %23 : vector<1x8xf32> to vector<1x1x8xf32>
    %cst_8 = arith.constant dense<0.000000e+00> : vector<1xf32>
    %25 = vector.multi_reduction <add>, %24, %cst_8 [1, 2] : vector<1x1x8xf32> to vector<1xf32>
    %26 = vector.shape_cast %25 : vector<1xf32> to vector<1x1x1xf32>
    %27 = vector.extract %26[0, 0, 0] : f32 from vector<1x1x1xf32>
    %cst_9 = arith.constant 1.000000e+00 : f32
    %28 = arith.divf %cst_9, %27 : f32
    %29 = vector.broadcast %28 : f32 to vector<1x1xf32>
    %c0_10 = arith.constant 0 : index
    %c0_11 = arith.constant 0 : index
    %30 = vector.load %arg2[%c0_10, %c0_11] : memref<1x1xf32, #tpu.memory_space<vmem>>, vector<1x1xf32>
    tpu.vector_store %arg2[%c0_10, %c0_11], %29 {strides = array<i32>} : memref<1x1xf32, #tpu.memory_space<vmem>>, vector<1x1xf32>,
    %c0_12 = arith.constant 0 : index
    %c0_13 = arith.constant 0 : index
    %31 = vector.load %arg3[%c0_12, %c0_13] : memref<1x8xf32, #tpu.memory_space<vmem>>, vector<1x8xf32>
    tpu.vector_store %arg3[%c0_12, %c0_13], %22 {strides = array<i32>} : memref<1x8xf32, #tpu.memory_space<vmem>>, vector<1x8xf32>,
    %c0_14 = arith.constant 0 : index
    %c0_15 = arith.constant 0 : index
    %32 = vector.load %arg4[%c0_14, %c0_15] : memref<1x36xf32, #tpu.memory_space<vmem>>, vector<1x36xf32>
    tpu.vector_store %arg4[%c0_14, %c0_15], %12 {strides = array<i32>} : memref<1x36xf32, #tpu.memory_space<vmem>>, vector<1x36xf32>,
    return
  }
}

</mosaic_0001>

<bundles_post_ra>
// kernel: tpu_custom_call.1
= control target key start
LH: loop header
LB: loop body
LE: loop exit
PB: predicated region body
PF: predicated region fallthrough
CT: control target
= control target key end

     0   :  { %10 = vsyncpa [#allocation3], 0  ;;  %s436_s0 = inlined_call_operand.hbm [shape: f32[8,36], index: 0, kind: input, shape index: {}]   ;;  %s437_s1 = inlined_call_operand.hbm [shape: f32[1,8], index: 1, kind: input, shape index: {}]   ;;  %s438_s2 = inlined_call_operand.hbm [shape: f32[1,1], index: 2, kind: output, shape index: {0}]   ;;  %s439_s3 = inlined_call_operand.hbm [shape: f32[1,8], index: 3, kind: output, shape index: {1}]   ;;  %s440_s4 = inlined_call_operand.hbm [shape: f32[1,36], index: 4, kind: output, shape index: {2}]  }
   0x1   :  { %11 = vsyncpa [#allocation6], 0 }
   0x2   :  { %12 = vsyncpa [#allocation4], 0 }
   0x3   :  { %13 = vsyncpa [#allocation9], 0  ;;  %s19_s17 = sshll.u32 %s436_s0, 4  ;;  %s386_s18 = smov [#allocation2]   ;;  %s20_s17 = int_to_ptr.hbm [resolvable:$true] %s19_s17 }
   0x4   :  { %s21_s19 = sshll.u32 %s386_s18, 4  ;;  %s30_s22 = sshll.u32 %s437_s1, 4  ;;  %s22_s19 = int_to_ptr.vmem [resolvable:$true] %s21_s19  ;;  %s31_s22 = int_to_ptr.hbm [resolvable:$true] %s30_s22 }
   0x5   :  { %24 = dma.hbm_to_vmem [thread:$0]  %s20_s17, 128, %s22_s19, [#allocation3]  }
   0x6   :  { %s387_s23 = smov [#allocation5]  }
   0x7   :  { %s32_s24 = sshll.u32 %s387_s23, 4  ;;  %s33_s24 = int_to_ptr.vmem [resolvable:$true] %s32_s24 }
   0x8   :  { %35 = dma.hbm_to_vmem [thread:$0]  %s31_s22, 16, %s33_s24, [#allocation6]  }
   0x9   :  { %378 = dma.done.wait [#allocation3], 128  }
   0xa   :  { %379 = vsyncadd [#allocation3], 4294967168 }
   0xb   :  { %380 = dma.done.wait [#allocation6], 16  }
   0xc   :  { %381 = vsyncadd [#allocation6], 4294967280  ;;  %vm46_vm0 = vcmask 64512   ;;  %v44_v0 = vld [vmem:[#allocation2] sm:$0xff]  ;;  %v45_v1 = vld [vmem:[#allocation5] sm:$0x1] }
   0xd   :  { %65 = vmatpush.msra.mxu0 %v44_v0  ;;  %vm71_vm1 = vcmask 286720   ;;  %vm97_vm5 = vcmask 293888   ;;  %vm125_vm6 = vcmask 57344   ;;  %s388_s29 = smov [#allocation8]   ;;  %s201_s7 = sshll.u32 %s439_s3, 4  ;;  %vm179_vm14 = vcmask 0   ;;  %s202_s7 = int_to_ptr.hbm [resolvable:$true] %s201_s7 }
   0xe   :  { %232 = vmatmul.msk.f32.vlgmr.msra.gmra.mxu0 %vm46_vm0, %v45_v1  ;;  %233 = vmatpush.xpose.msk.msra.mxu1 %vm97_vm5, %v44_v0  ;;  %s199_s30 = sshll.u32 %s388_s29, 4  ;;  %s389_s8 = smov [#allocation10]   ;;  %s200_s30 = int_to_ptr.vmem [resolvable:$true] %s199_s30 }
   0xf   :  { %s210_s9 = sshll.u32 %s389_s8, 4  ;;  %s212_s12 = sshll.u32 %s440_s4, 4  ;;  %s211_s9 = int_to_ptr.vmem [resolvable:$true] %s210_s9  ;;  %s213_s12 = int_to_ptr.hbm [resolvable:$true] %s212_s12 }
  0x10   :  { %s190_s14 = sshll.u32 %s438_s2, 4  ;;  %s390_s15 = smov [#allocation7]   ;;  %s191_s14 = int_to_ptr.hbm [resolvable:$true] %s190_s14 }
  0x11   :  { %s188_s16 = sshll.u32 %s390_s15, 4  ;;  %s189_s16 = int_to_ptr.vmem [resolvable:$true] %s188_s16 }
  0x8b   :  { %v67_v2 = vpop.f32.mrf.mxu0 }
  0x8c   :  { %v70_v3 = vmul.f32 %v67_v2, %v67_v2 }
  0x8e   :  { %v72_v4 = vsel %vm71_vm1, %v70_v3, 0.0 }
  0x8f   :  { %73 = vadd.xlane.f32.xlu0 %v72_v4 }
 0x102   :  { %v74_v5 = vpop.xlane.xlu0 %73 }
 0x103   :  { %v75_v6 = vrot.slane %v74_v5, 4 }
 0x105   :  { %v76_v7 = vadd.f32 %v75_v6, %v74_v5 }
 0x107   :  { %v77_v8 = vrot.slane %v76_v7, 2 }
 0x109   :  { %v78_v9 = vadd.f32 %v77_v8, %v76_v7 }
 0x10b   :  { %v79_v10 = vrot.slane %v78_v9, 1 }
 0x10d   :  { %v80_v11 = vadd.f32 %v79_v10, %v78_v9 }
 0x10f   :  { %235 = vpush %v80_v11 }
 0x140   :  { %s236_s0 = spop %235 }
 0x141   :  { %s82_s1 = sadd.f32 1e-24, %s236_s0 }
 0x143   :  { %v83_v12 = vstv %s82_s1 }
 0x144   :  { %252 = vrsqrt.f32 %v83_v12  ;;  %vm90_vm3 = vweird.f32 %v83_v12 }
 0x14a   :  { %v253_v13 = vpop.eup %252 }
 0x14b   :  { %v85_v14 = vmul.f32 %v253_v13, %v83_v12  ;;  %vm91_vm2 = vweird.f32 %v253_v13 }
 0x14c   :  { %vm92_vm4 = vmor %vm90_vm3, %vm91_vm2 }
 0x14d   :  { %v86_v15 = vmul.f32 %v253_v13, %v85_v14 }
 0x14f   :  { %v87_v16 = vmul.f32 0.5, %v86_v15 }
 0x151   :  { %v88_v17 = vsub.f32 1.5, %v87_v16 }
 0x153   :  { %v89_v18 = vmul.f32 %v253_v13, %v88_v17 }
 0x155   :  { %v93_v19 = vsel %vm92_vm4, %v253_v13, %v89_v18 }
 0x156   :  { %237 = vpush %v93_v19 }
 0x187   :  { %s238_s25 = spop %237 }
 0x188   :  { %v95_v20 = vstv %s238_s25 }
 0x189   :  { %v96_v21 = vmul.f32 %v95_v20, %v67_v2 }
 0x18b   :  { %182 = vst.msk [vmem:[#allocation10] sm:$0x1] %vm71_vm1, %v96_v21  ;;  %234 = vmatmul.msk.f32.vlgmr.msra.gmra.mxu1 %vm97_vm5, %v96_v21 }
 0x208   :  { %v121_v22 = vpop.f32.mrf.mxu1 }
 0x209   :  { %v124_v23 = vmul.f32 %v121_v22, %v121_v22 }
 0x20b   :  { %v126_v24 = vsel %vm125_vm6, %v124_v23, 0.0 }
 0x20c   :  { %127 = vadd.xlane.f32.xlu0 %v126_v24 }
 0x27f   :  { %v128_v25 = vpop.xlane.xlu0 %127 }
 0x280   :  { %v129_v26 = vrot.slane %v128_v25, 4 }
 0x282   :  { %v130_v27 = vadd.f32 %v129_v26, %v128_v25 }
 0x284   :  { %v131_v28 = vrot.slane %v130_v27, 2 }
 0x286   :  { %v132_v29 = vadd.f32 %v131_v28, %v130_v27 }
 0x288   :  { %v133_v30 = vrot.slane %v132_v29, 1 }
 0x28a   :  { %v134_v31 = vadd.f32 %v133_v30, %v132_v29 }
 0x28c   :  { %239 = vpush %v134_v31 }
 0x2bd   :  { %s240_s26 = spop %239 }
 0x2be   :  { %s136_s27 = sadd.f32 1e-24, %s240_s26 }
 0x2c0   :  { %v137_v32 = vstv %s136_s27 }
 0x2c1   :  { %254 = vrsqrt.f32 %v137_v32  ;;  %vm144_vm8 = vweird.f32 %v137_v32 }
 0x2c7   :  { %v255_v33 = vpop.eup %254 }
 0x2c8   :  { %v139_v34 = vmul.f32 %v255_v33, %v137_v32  ;;  %vm145_vm7 = vweird.f32 %v255_v33 }
 0x2c9   :  { %vm146_vm9 = vmor %vm144_vm8, %vm145_vm7 }
 0x2ca   :  { %v140_v35 = vmul.f32 %v255_v33, %v139_v34 }
 0x2cc   :  { %v141_v36 = vmul.f32 0.5, %v140_v35 }
 0x2ce   :  { %v142_v37 = vsub.f32 1.5, %v141_v36 }
 0x2d0   :  { %v143_v38 = vmul.f32 %v255_v33, %v142_v37 }
 0x2d2   :  { %v147_v39 = vsel %vm146_vm9, %v255_v33, %v143_v38 }
 0x2d3   :  { %241 = vpush %v147_v39 }
 0x304   :  { %s242_s28 = spop %241 }
 0x305   :  { %v149_v40 = vstv %s242_s28 }
 0x306   :  { %v150_v41 = vmul.f32 %v149_v40, %v121_v22 }
 0x308   :  { %181 = vst.msk [vmem:[#allocation8] sm:$0x1] %vm125_vm6, %v150_v41  ;;  %v151_v42 = vmul.f32 %v150_v41, %v121_v22 }
 0x309   :  { %204 = dma.vmem_to_hbm [thread:$0]  %s200_s30, 16, %s202_s7, [#allocation9]  }
 0x30a   :  { %v152_v43 = vsel %vm125_vm6, %v151_v42, 0.0  ;;  %215 = dma.vmem_to_hbm [thread:$0]  %s211_s9, 16, %s213_s12, [#allocation9]  }
 0x30b   :  { %153 = vadd.xlane.f32.xlu1 %v152_v43 }
 0x37e   :  { %v154_v44 = vpop.xlane.xlu1 %153 }
 0x37f   :  { %v155_v45 = vrot.slane %v154_v44, 4 }
 0x381   :  { %v156_v46 = vadd.f32 %v155_v45, %v154_v44 }
 0x383   :  { %v157_v47 = vrot.slane %v156_v46, 2 }
 0x385   :  { %v158_v48 = vadd.f32 %v157_v47, %v156_v46 }
 0x387   :  { %v159_v49 = vrot.slane %v158_v48, 1 }
 0x389   :  { %v160_v50 = vadd.f32 %v159_v49, %v158_v48 }
 0x38b   :  { %243 = vpush %v160_v50 }
 0x3bc   :  { %s244_s13 = spop %243 }
 0x3bd   :  { %v162_v51 = vstv %s244_s13 }
 0x3be   :  { %256 = vrcp.f32 %v162_v51  ;;  %v174_v55 = vand.u32 2147483648, %v162_v51  ;;  %v172_v57 = vand.u32 2147483647, %v162_v51  ;;  %vm168_vm11 = vweird.f32 %v162_v51 }
 0x3c0   :  { %v175_v59 = vor.u32 1.1754944e-38, %v174_v55  ;;  %vm173_vm13 = vcmp.eq.f32.partialorder %v172_v57, 8.507059e+37 }
 0x3c4   :  { %v257_v52 = vpop.eup %256 }
 0x3c5   :  { %v164_v53 = vmul.f32 %v257_v52, %v162_v51  ;;  %vm169_vm10 = vweird.f32 %v257_v52 }
 0x3c6   :  { %vm170_vm12 = vmor %vm168_vm11, %vm169_vm10 }
 0x3c7   :  { %v165_v54 = vsub.f32 1.0, %v164_v53 }
 0x3c9   :  { %v166_v56 = vmul.f32 %v257_v52, %v165_v54 }
 0x3cb   :  { %v167_v58 = vadd.f32 %v257_v52, %v166_v56 }
 0x3cd   :  { %v171_v60 = vsel %vm170_vm12, %v257_v52, %v167_v58 }
 0x3ce   :  { %v176_v61 = vsel %vm173_vm13, %v175_v59, %v171_v60 }
 0x3cf   :  { %245 = vpush %v176_v61 }
 0x400   :  { %s246_s17 = spop %245 }
 0x401   :  { %v178_v62 = vstv %s246_s17 }
 0x402   :  { %180 = vst.msk [vmem:[#allocation7] sm:$0x1] %vm179_vm14, %v178_v62 }
 0x403   :  { %193 = dma.vmem_to_hbm [thread:$0]  %s189_s16, 16, %s191_s14, [#allocation4]  }
 0x404   :  { %382 = dma.done.wait [#allocation4], 16  }
 0x405   :  { %383 = vsyncadd [#allocation4], 4294967280 }
 0x406   :  { %384 = dma.done.wait [#allocation9], 32  }
 0x407   :  { %385 = vsyncadd [#allocation9], 4294967264 }
 0x408   :  { %228 = vsyncpa [#allocation3], 1 }
 0x409   :  { %229 = vsyncpa [#allocation6], 1 }
 0x40a   :  { %230 = vsyncpa [#allocation4], 1 }
 0x40b   :  { %231 = vsyncpa [#allocation9], 1 }

</bundles_post_ra>
